<compile_context>
chip_gen: v6e
topology: v6e:2x2x1
jax: 0.10.0
libtpu: 0.0.40
codegen_flags: <defaults>
</compile_context>

<pallas_src>
import jax
import jax.numpy as jnp
from jax import lax
from jax.experimental import pallas as pl
from jax.experimental.pallas import tpu as pltpu


def _routing_two_kernel(x1_ref, x2_ref, w1_ref, w2_ref, b_ref, o_ref):
    # x1_ref/x2_ref: (TILE_N, C) activation tiles
    # w1_ref/w2_ref: (C, E) pre-transposed weights (VMEM-resident across the grid)
    # b_ref:         (1, E) pre-summed bias
    # o_ref:         (TILE_N, E)
    cd = jnp.promote_types(x1_ref.dtype, w1_ref.dtype)   # bf16 acts + f32 w -> f32
    dn = (((1,), (0,)), ((), ()))                          # canonical [M,K]x[K,N]
    y = lax.dot_general(
        x1_ref[...].astype(cd), w1_ref[...].astype(cd), dn,
        preferred_element_type=jnp.float32,
    )
    y = y + lax.dot_general(
        x2_ref[...].astype(cd), w2_ref[...].astype(cd), dn,
        preferred_element_type=jnp.float32,
    )
    # Bias add + sigmoid in f32 (v5e has no bf16 VPU/EUP); cast only on store.
    o_ref[...] = jax.nn.sigmoid(y + b_ref[...].astype(jnp.float32)).astype(o_ref.dtype)


def prepare_routing_two_params(w1, b1, w2, b2):
    """One-time parameter prep (NOT per call).

    w1, w2 : (num_experts, in_channels)  -- torch.nn.Linear weight layout
    b1, b2 : (num_experts,)
    returns: w1t (in_channels, num_experts)   -- pre-transposed
             w2t (in_channels, num_experts)   -- pre-transposed
             b   (1, num_experts)             -- b1 + b2 pre-summed
    """
    w1t = jnp.transpose(jnp.asarray(w1))
    w2t = jnp.transpose(jnp.asarray(w2))
    b = (jnp.asarray(b1) + jnp.asarray(b2)).reshape(1, -1)
    return w1t, w2t, b


def routing_two_batched(x1, x2, w1t, w2t, b, *, tile_n=4096, out_dtype=jnp.float32):
    """Batched forward: x1, x2 are (N, C) (or anything reshaping to that).

    Tiled over rows; weights/bias stay VMEM-resident across the grid. Activations
    may be float32 or bfloat16 (accumulation is always f32).
    Returns (N, num_experts) in `out_dtype`.
    """
    N = x1.shape[0]
    x1 = x1.reshape(N, -1)
    x2 = x2.reshape(N, -1)
    C, E = w1t.shape
    assert x1.shape[1] == C and x2.shape[1] == C and w2t.shape == (C, E)
    assert b.shape == (1, E)

    # Row tile: single full-extent block for small N (exempt from the 8-divisibility
    # rule); otherwise a multiple-of-8 tile with a cdiv grid.
    tn = min(tile_n, N)
    if tn < N:
        tn = max(8, (tn // 8) * 8)
    grid = (pl.cdiv(N, tn),)

    return pl.pallas_call(
        _routing_two_kernel,
        out_shape=jax.ShapeDtypeStruct((N, E), out_dtype),
        grid_spec=pltpu.PrefetchScalarGridSpec(
            num_scalar_prefetch=0,
            grid=grid,
            in_specs=[
                pl.BlockSpec((tn, C), lambda i: (i, 0)),   # x1 tile
                pl.BlockSpec((tn, C), lambda i: (i, 0)),   # x2 tile
                pl.BlockSpec((C, E), lambda i: (0, 0)),    # w1t (resident)
                pl.BlockSpec((C, E), lambda i: (0, 0)),    # w2t (resident)
                pl.BlockSpec((1, E), lambda i: (0, 0)),    # bias (resident)
            ],
            out_specs=pl.BlockSpec((tn, E), lambda i: (i, 0)),
        ),
        compiler_params=pltpu.CompilerParams(
            dimension_semantics=("parallel",),             # shards rows across TCs on v7x
        ),
    )(x1, x2, w1t, w2t, b)


def routing_two(x1, x2, w1t, w2t, b, *, use_pallas=False):
    """Single-sample forward matching the PyTorch module exactly (eval mode).

    x1, x2 : any shape that flattens to (in_channels,)  (e.g. NCHW (1, C, 1, 1))
    Per the perf review, at N=1 a standalone pallas_call is pure launch/DMA
    overhead, so the default path is plain XLA (it fuses with neighboring ops).
    Set use_pallas=True to route through the kernel, or batch many routing
    decisions into `routing_two_batched`.
    """
    C, E = w1t.shape
    if use_pallas:
        return routing_two_batched(
            x1.reshape(1, C), x2.reshape(1, C), w1t, w2t, b
        )[0]
    x1f = jnp.reshape(x1, (C,)).astype(jnp.float32)
    x2f = jnp.reshape(x2, (C,)).astype(jnp.float32)
    y = x1f @ w1t.astype(jnp.float32) + x2f @ w2t.astype(jnp.float32) + b[0]
    return jax.nn.sigmoid(y)


if __name__ == "__main__":
    # Small shapes consistent with the module: globally-pooled features.
    in_channels = 32
    num_experts = 8
    dropout_rate = 0.2  # identity in eval mode

    key = jax.random.PRNGKey(0)
    k_x1, k_x2, k_w1, k_b1, k_w2, k_b2, k_xb1, k_xb2 = jax.random.split(key, 8)

    # Inputs: NCHW (1, C, 1, 1) -> flatten to (C,)
    x1 = jax.random.normal(k_x1, (1, in_channels, 1, 1), jnp.float32)
    x2 = jax.random.normal(k_x2, (1, in_channels, 1, 1), jnp.float32)

    # Deterministic parameter init (PyTorch Linear default: U(-1/sqrt(C), 1/sqrt(C)))
    bound = 1.0 / (in_channels ** 0.5)
    w1 = jax.random.uniform(k_w1, (num_experts, in_channels), jnp.float32, -bound, bound)
    b1 = jax.random.uniform(k_b1, (num_experts,), jnp.float32, -bound, bound)
    w2 = jax.random.uniform(k_w2, (num_experts, in_channels), jnp.float32, -bound, bound)
    b2 = jax.random.uniform(k_b2, (num_experts,), jnp.float32, -bound, bound)

    # One-time weight prep (pre-transposed weights + pre-summed bias).
    w1t, w2t, b = prepare_routing_two_params(w1, b1, w2, b2)

    # Reference (exact module math).
    ref1 = jax.nn.sigmoid(x1.reshape(-1) @ w1.T + b1 + x2.reshape(-1) @ w2.T + b2)

    # --- single-sample path: plain XLA (default) and Pallas (forced) ---
    out = routing_two(x1, x2, w1t, w2t, b)
    jax.block_until_ready(out)
    assert out.shape == (num_experts,)
    assert jnp.allclose(out, ref1, atol=1e-5, rtol=1e-5)

    out_p = routing_two(x1, x2, w1t, w2t, b, use_pallas=True)
    jax.block_until_ready(out_p)
    assert jnp.allclose(out_p, ref1, atol=1e-5, rtol=1e-5)

    # --- batched path (multi-block grid exercised with tile_n=16) ---
    N = 64
    x1b = jax.random.normal(k_xb1, (N, in_channels), jnp.float32)
    x2b = jax.random.normal(k_xb2, (N, in_channels), jnp.float32)
    refb = jax.nn.sigmoid(x1b @ w1.T + b1 + x2b @ w2.T + b2)

    outb = routing_two_batched(x1b, x2b, w1t, w2t, b, tile_n=16)  # grid=(4,)
    jax.block_until_ready(outb)
    assert outb.shape == (N, num_experts)
    assert jnp.allclose(outb, refb, atol=1e-5, rtol=1e-5)

    outb_full = routing_two_batched(x1b, x2b, w1t, w2t, b)        # single block
    jax.block_until_ready(outb_full)
    assert jnp.allclose(outb_full, refb, atol=1e-5, rtol=1e-5)

    # --- bf16 activations (f32 accumulation + f32 sigmoid preserved) ---
    outb_bf16 = routing_two_batched(
        x1b.astype(jnp.bfloat16), x2b.astype(jnp.bfloat16), w1t, w2t, b, tile_n=16
    )
    jax.block_until_ready(outb_bf16)
    assert jnp.allclose(outb_bf16, refb, atol=3e-2, rtol=3e-2)

    print("KERNEL_OK")
</pallas_src>

<mosaic_0001>
module attributes {stable_mosaic.version = 11 : i64} {
  func.func @_routing_two_kernel(%arg0: i32, %arg1: memref<1x32xf32, #tpu.memory_space<vmem>>, %arg2: memref<1x32xf32, #tpu.memory_space<vmem>>, %arg3: memref<32x8xf32, #tpu.memory_space<vmem>>, %arg4: memref<32x8xf32, #tpu.memory_space<vmem>>, %arg5: memref<1x8xf32, #tpu.memory_space<vmem>>, %arg6: memref<1x8xf32, #tpu.memory_space<vmem>>) attributes {dimension_semantics = [#tpu.dimension_semantics<parallel>], iteration_bounds = array<i64: 1>, scalar_prefetch = 0 : i64, scratch_operands = 0 : i64, tpu.core_type = #tpu.core_type<tc>, window_params = [{transform_indices = @transform_0, window_bounds = array<i64: 1, 32>}, {transform_indices = @transform_1, window_bounds = array<i64: 1, 32>}, {pipeline_mode = #tpu.pipeline_mode<synchronous>, transform_indices = @transform_2, window_bounds = array<i64: 32, 8>}, {pipeline_mode = #tpu.pipeline_mode<synchronous>, transform_indices = @transform_3, window_bounds = array<i64: 32, 8>}, {pipeline_mode = #tpu.pipeline_mode<synchronous>, transform_indices = @transform_4, window_bounds = array<i64: 1, 8>}, {transform_indices = @transform_5, window_bounds = array<i64: 1, 8>}]} {
    %c0 = arith.constant 0 : index
    %c0_0 = arith.constant 0 : index
    %0 = vector.load %arg1[%c0, %c0_0] : memref<1x32xf32, #tpu.memory_space<vmem>>, vector<1x32xf32>
    %c0_1 = arith.constant 0 : index
    %c0_2 = arith.constant 0 : index
    %1 = vector.load %arg3[%c0_1, %c0_2] : memref<32x8xf32, #tpu.memory_space<vmem>>, vector<32x8xf32>
    %cst = arith.constant dense<0.000000e+00> : vector<1x8xf32>
    %2 = tpu.matmul %0, %1, %cst {dimension_numbers = #tpu.dot_dimension_numbers<[1], [0], [0], [1], [0, 0, 1, 1], [], []>} : vector<1x32xf32>, vector<32x8xf32>, vector<1x8xf32> -> vector<1x8xf32>
    %c0_3 = arith.constant 0 : index
    %c0_4 = arith.constant 0 : index
    %3 = vector.load %arg2[%c0_3, %c0_4] : memref<1x32xf32, #tpu.memory_space<vmem>>, vector<1x32xf32>
    %c0_5 = arith.constant 0 : index
    %c0_6 = arith.constant 0 : index
    %4 = vector.load %arg4[%c0_5, %c0_6] : memref<32x8xf32, #tpu.memory_space<vmem>>, vector<32x8xf32>
    %cst_7 = arith.constant dense<0.000000e+00> : vector<1x8xf32>
    %5 = tpu.matmul %3, %4, %cst_7 {dimension_numbers = #tpu.dot_dimension_numbers<[1], [0], [0], [1], [0, 0, 1, 1], [], []>} : vector<1x32xf32>, vector<32x8xf32>, vector<1x8xf32> -> vector<1x8xf32>
    %6 = arith.addf %2, %5 : vector<1x8xf32>
    %c0_8 = arith.constant 0 : index
    %c0_9 = arith.constant 0 : index
    %7 = vector.load %arg5[%c0_8, %c0_9] : memref<1x8xf32, #tpu.memory_space<vmem>>, vector<1x8xf32>
    %8 = arith.addf %6, %7 : vector<1x8xf32>
    %9 = arith.negf %8 : vector<1x8xf32>
    %10 = math.exp %9 : vector<1x8xf32>
    %cst_10 = arith.constant 1.000000e+00 : f32
    %11 = vector.broadcast %cst_10 : f32 to vector<1x8xf32>
    %12 = arith.addf %11, %10 : vector<1x8xf32>
    %13 = arith.divf %11, %12 : vector<1x8xf32>
    %c0_11 = arith.constant 0 : index
    %c0_12 = arith.constant 0 : index
    %14 = vector.load %arg6[%c0_11, %c0_12] : memref<1x8xf32, #tpu.memory_space<vmem>>, vector<1x8xf32>
    tpu.vector_store %arg6[%c0_11, %c0_12], %13 {strides = array<i32>} : memref<1x8xf32, #tpu.memory_space<vmem>>, vector<1x8xf32>,
    return
  }
  func.func @transform_0(%arg0: i32) -> (i32, i32) {
    %c0_i32 = arith.constant 0 : i32
    %c0_i32_0 = arith.constant 0 : i32
    return %arg0, %c0_i32 : i32, i32
  }
  func.func @transform_1(%arg0: i32) -> (i32, i32) {
    %c0_i32 = arith.constant 0 : i32
    %c0_i32_0 = arith.constant 0 : i32
    return %arg0, %c0_i32 : i32, i32
  }
  func.func @transform_2(%arg0: i32) -> (i32, i32) {
    %c0_i32 = arith.constant 0 : i32
    %c0_i32_0 = arith.constant 0 : i32
    %c0_i32_1 = arith.constant 0 : i32
    return %c0_i32, %c0_i32_0 : i32, i32
  }
  func.func @transform_3(%arg0: i32) -> (i32, i32) {
    %c0_i32 = arith.constant 0 : i32
    %c0_i32_0 = arith.constant 0 : i32
    %c0_i32_1 = arith.constant 0 : i32
    return %c0_i32, %c0_i32_0 : i32, i32
  }
  func.func @transform_4(%arg0: i32) -> (i32, i32) {
    %c0_i32 = arith.constant 0 : i32
    %c0_i32_0 = arith.constant 0 : i32
    %c0_i32_1 = arith.constant 0 : i32
    return %c0_i32, %c0_i32_0 : i32, i32
  }
  func.func @transform_5(%arg0: i32) -> (i32, i32) {
    %c0_i32 = arith.constant 0 : i32
    %c0_i32_0 = arith.constant 0 : i32
    return %arg0, %c0_i32 : i32, i32
  }
}

</mosaic_0001>

<bundles_post_ra>
// kernel: tpu_custom_call.1
= control target key start
LH: loop header
LB: loop body
LE: loop exit
PB: predicated region body
PF: predicated region fallthrough
CT: control target
= control target key end

     0   :  { %v266_v2 = vmov 0.0   ;;  %s335_s0 = inlined_call_operand.vmem [shape: f32[1,32], index: 0, kind: input, shape index: {}]   ;;  %s336_s1 = inlined_call_operand.vmem [shape: f32[1,32], index: 1, kind: input, shape index: {}]   ;;  %s337_s2 = inlined_call_operand.vmem [shape: f32[32,8], index: 2, kind: input, shape index: {}]   ;;  %s338_s3 = inlined_call_operand.vmem [shape: f32[32,8], index: 3, kind: input, shape index: {}]   ;;  %s339_s4 = inlined_call_operand.vmem [shape: f32[1,8], index: 4, kind: input, shape index: {}]   ;;  %s340_s5 = inlined_call_operand.hbm [shape: f32[1,8], index: 5, kind: output, shape index: {}]  }
   0x1   :  { %v30_v0 = vld [vmem:[%s338_s3 + $0x18] sm:$0xff]  ;;  %215 = vmatprep.subr.mxu0 %v266_v2  ;;  %226 = vmatprep.subr.mxu1 %v266_v2  ;;  %v29_v3 = vld [vmem:[%s338_s3 + $0x10] sm:$0xff]  ;;  %v28_v5 = vld [vmem:[%s338_s3 + $0x8] sm:$0xff] }
   0x2   :  { %v25_v1 = vld [vmem:[%s337_s2 + $0x18] sm:$0xff]  ;;  %v24_v4 = vld [vmem:[%s337_s2 + $0x10] sm:$0xff]  ;;  %216 = vmatpush3.msra.mxu0 %v30_v0  ;;  %v23_v6 = vld [vmem:[%s337_s2 + $0x8] sm:$0xff] }
   0x3   :  { %227 = vmatpush3.msra.mxu1 %v25_v1  ;;  %217 = vmatprep.subr.mxu0 %v266_v2 }
   0x4   :  { %228 = vmatprep.subr.mxu1 %v266_v2 }
   0x5   :  { %10 = vsyncpa [#allocation3], 0  ;;  %218 = vmatpush3.msra.mxu0 %v29_v3  ;;  %229 = vmatpush3.msra.mxu1 %v24_v4  ;;  %v27_v7 = vld [vmem:[%s338_s3] sm:$0xff]  ;;  %vm31_vm0 = vcmask 261120   ;;  %vm267_vm1 = vmmov 0   ;;  %vm186_vm2 = vcmask 57344  }
   0x6   :  { %219 = vmatprep.subr.mxu0 %v266_v2  ;;  %230 = vmatprep.subr.mxu1 %v266_v2  ;;  %v22_v8 = vld [vmem:[%s337_s2] sm:$0xff] }
   0x7   :  { %220 = vmatpush3.msra.mxu0 %v28_v5  ;;  %231 = vmatpush3.msra.mxu1 %v23_v6  ;;  %v26_v9 = vld [vmem:[%s336_s1] sm:$0x1] }
   0x8   :  { %221 = vmatprep.subr.mxu0 %v266_v2  ;;  %232 = vmatprep.subr.mxu1 %v266_v2  ;;  %v21_v10 = vld [vmem:[%s335_s0] sm:$0x1]  ;;  %s268_s0 = smov [#allocation2]  }
   0x9   :  { %222 = vmatpush3.msra.mxu0 %v27_v7  ;;  %223 = vmatprep.mubr.msk.f32.mxu0 %vm267_vm1, %v266_v2  ;;  %v178_v13 = vld [vmem:[%s339_s4] sm:$0x1]  ;;  %s194_s1 = sshll.u32 %s268_s0, 4  ;;  %s195_s1 = int_to_ptr.vmem [resolvable:$true] %s194_s1 }
   0xa   :  { %233 = vmatpush3.msra.mxu1 %v22_v8  ;;  %234 = vmatprep.mubr.msk.f32.mxu1 %vm267_vm1, %v266_v2  ;;  %s244_s13 = scalar_lea.vmem %s195_s1, 16  ;;  %s248_s14 = scalar_lea.vmem %s195_s1, 32 }
   0xb   :  { %224 = vmatmul.mubr.msk.f32.vlgmr.msra.gmra.mxu0 %vm31_vm0, %v26_v9  ;;  %235 = vmatmul.mubr.msk.f32.vlgmr.msra.gmra.mxu1 %vm31_vm0, %v21_v10  ;;  %p245_p0 = scmp.ne.s32.totalorder %s195_s1, %s244_s13  ;;  %p249_p1 = scmp.lt.s32.totalorder %s195_s1, %s195_s1 }
   0xc   :  { %p250_p2 = scmp.lt.s32.totalorder %s248_s14, %s244_s13 }
   0xe   :  { %p251_p3 = por %p250_p2, %p249_p1 }
  0x10   :  { %p252_p4 = pnand %p251_p3, %p245_p0 }
  0xcb   :  { %v101_v11 = vpop.f32.mrf.mxu0  ;;  %v174_v12 = vpop.f32.mrf.mxu1 }
  0xcc   :  { %v175_v14 = vadd.f32 %v174_v12, %v101_v11 }
  0xcd   :  { %v225_v15 = vpop.f32.mrf.mxu0  ;;  %v236_v16 = vpop.f32.mrf.mxu1 }
  0xce   :  { %v179_v17 = vadd.f32 %v178_v13, %v175_v14 }
  0xd0   :  { %v204_v18 = vmul.f32 -1.442695, %v179_v17 }
  0xd2   :  { %240 = vpow2.f32 %v204_v18 }
  0xdf   :  { %v241_v19 = vpop.eup %240 }
  0xe0   :  { %v183_v20 = vadd.f32 1.0, %v241_v19 }
  0xe2   :  { %242 = vrcp.f32 %v183_v20 }
  0xef   :  { %v243_v21 = vpop.eup %242 }
  0xf0   :  { %187 = vst.msk [vmem:[#allocation2] sm:$0x1] %vm186_vm2, %v243_v21 }
  0xf1   :  { %255 = shalt.err (!%p252_p4)
}
  0xf2   :  { %197 = dma.vmem_to_hbm [thread:$0]  %s195_s1, 16, %s340_s5, [#allocation3]  }
  0xf3   :  { %264 = dma.done.wait [#allocation3], 16  }
  0xf4   :  { %265 = vsyncadd [#allocation3], 4294967280 }
  0xf5   :  { %201 = vsyncpa [#allocation3], 1 }

</bundles_post_ra>
